<compile_context>
chip_gen: v7x
topology: tpu7x:2x2x1
jax: 0.10.0
libtpu: 0.0.40
codegen_flags: <defaults>
</compile_context>

<pallas_src>
import functools

import numpy as np

import jax
import jax.numpy as jnp
from jax import lax
from jax.experimental import pallas as pl
from jax.experimental.pallas import tpu as pltpu


_VMEM_LIMIT_BYTES = 32 * 1024 * 1024   # safe scoped limit on v5e / v6e / v7x
_TILE_VMEM_BUDGET = 20 * 1024 * 1024   # headroom for double-buffered tiles
_BN_EPS = 1e-5


# ---------------------------------------------------------------------------
# Kernel 1: fused global average pool + channel mean (single HBM pass)
# ---------------------------------------------------------------------------

def _pool_cmean_kernel(inv_s, x_ref, pooled_ref, cmean_ref, acc_ref):
    """One streaming pass over an [N, C, S_tile] block:
       - accumulate the global average pool (AvgPool3d over full T,H,W)
       - emit the channel mean (ChannelReducer dim=1, keepdim) for this tile."""
    step = pl.program_id(0)

    @pl.when(step == 0)
    def _init():
        acc_ref[...] = jnp.zeros_like(acc_ref)

    x = x_ref[...]                                         # [N, C, TS]
    acc_ref[...] += jnp.sum(x, axis=-1)                    # partial sum over S
    cmean_ref[...] = jnp.mean(x, axis=1, keepdims=True)    # [N, 1, TS]

    @pl.when(step == pl.num_programs(0) - 1)
    def _finalize():
        pooled_ref[...] = acc_ref[...] * inv_s


def _choose_s_tile(n, c, s):
    """Largest lane-dense (multiple of 128) tile that divides S and fits VMEM."""
    if s % 128 != 0:
        return s                      # full-extent block (small / ragged S)
    for ts in (2048, 1024, 512, 256, 128):
        if s % ts != 0:
            continue
        # input + cmean tiles double-buffered + pooled accumulator
        need = 2 * 4 * (n * c * ts + n * ts) + 4 * n * c
        if need <= _TILE_VMEM_BUDGET:
            return ts
    return 128


def _fused_pool_and_channel_mean(x_flat):
    n, c, s = x_flat.shape
    ts = _choose_s_tile(n, c, s)
    grid = (s // ts,)
    kernel = functools.partial(_pool_cmean_kernel, 1.0 / float(s))
    pooled, cmean = pl.pallas_call(
        kernel,
        grid=grid,
        in_specs=[pl.BlockSpec((n, c, ts), lambda i: (0, 0, i))],
        out_specs=(pl.BlockSpec((n, c), lambda i: (0, 0)),
                   pl.BlockSpec((n, 1, ts), lambda i: (0, 0, i))),
        out_shape=(jax.ShapeDtypeStruct((n, c), jnp.float32),
                   jax.ShapeDtypeStruct((n, 1, s), jnp.float32)),
        scratch_shapes=[pltpu.VMEM((n, c), jnp.float32)],
        compiler_params=pltpu.CompilerParams(
            dimension_semantics=("arbitrary",),   # pooled accumulates over S tiles
            vmem_limit_bytes=_VMEM_LIMIT_BYTES),
        cost_estimate=pl.CostEstimate(
            flops=2 * n * c * s,
            transcendentals=0,
            bytes_accessed=4 * (n * c * s + n * c + n * s)),
    )(x_flat)
    return pooled, cmean


# ---------------------------------------------------------------------------
# Kernel 2: all key MLPs + attention in one launch
# ---------------------------------------------------------------------------

def _keys_attention_kernel(scale, num_inputs, token_prod,
                           pooled_ref, w1_ref, g1_ref, b1_ref,
                           w2_ref, g2_ref, b2_ref, attn_ref):
    keys = []
    for i in range(num_inputs):                               # static unroll (small)
        p = pooled_ref[i]                                     # [N, Cmax] (zero padded)
        h = jnp.dot(p, w1_ref[i], preferred_element_type=jnp.float32)
        mu = jnp.mean(h, axis=0, keepdims=True)               # BN training batch stats
        var = jnp.mean(jnp.square(h - mu), axis=0, keepdims=True)
        h = (h - mu) * lax.rsqrt(var + _BN_EPS) * g1_ref[i] + b1_ref[i]
        h = h * jnp.clip(h + 3.0, 0.0, 6.0) * (1.0 / 6.0)     # HSwish
        k = jnp.dot(h, w2_ref[i], preferred_element_type=jnp.float32)
        mu2 = jnp.mean(k, axis=0, keepdims=True)
        var2 = jnp.mean(jnp.square(k - mu2), axis=0, keepdims=True)
        keys.append((k - mu2) * lax.rsqrt(var2 + _BN_EPS) * g2_ref[i] + b2_ref[i])
    teacher = keys[-1]                                        # [N, Hd]

    n, attn_w = attn_ref.shape                                # lane-dense slab (>=128)
    col = lax.broadcasted_iota(jnp.int32, (n, attn_w), 1)
    logits = jnp.full((n, attn_w), -1e30, dtype=jnp.float32)
    for i in range(num_inputs - 1):
        li = scale * (jnp.sum(keys[i] * teacher, axis=-1, keepdims=True)
                      + token_prod[i])                        # token dot hoisted to host
        logits = jnp.where(col == i, jnp.broadcast_to(li, (n, attn_w)), logits)
    m = jnp.max(logits, axis=-1, keepdims=True)
    e = jnp.exp(logits - m)                                   # padded lanes -> exp(-1e30)=0
    attn_ref[...] = e * pl.reciprocal(jnp.sum(e, axis=-1, keepdims=True), approx=True)
    # TODO(synk): BatchNorm running-mean/var buffer updates (training side effect)
    # are not emitted.


# ---------------------------------------------------------------------------
# Kernel 3: separable trilinear upsample of the teacher channel mean
# ---------------------------------------------------------------------------

def _teacher_upsample_kernel(mt_list, t_in, x_ref, *refs):
    """Separable trilinear (align_corners=False) upsample to every student grid:
    a spatial kron(H, W) matmul per source frame, then a compile-time-weighted
    temporal blend.  refs = (mhwT_0..mhwT_{K-1}, out_0..out_{K-1})."""
    num_students = len(mt_list)
    mhw_refs = refs[:num_students]
    out_refs = refs[num_students:]
    x = x_ref[...]                                            # [N, T_in, HW_in]
    for i in range(num_students):
        mhw_t = mhw_refs[i][...]                              # [HW_in, HW_out]
        frames = [jnp.dot(x[:, t, :], mhw_t, preferred_element_type=jnp.float32)
                  for t in range(t_in)]                       # each [N, HW_out]
        mt = mt_list[i]                                       # numpy [T_out, T_in]
        for to in range(mt.shape[0]):
            acc = None
            for t in range(t_in):
                w = float(mt[to, t])                          # baked-in constant
                if w == 0.0:
                    continue
                term = frames[t] * w
                acc = term if acc is None else acc + term
            out_refs[i][:, to, :] = acc


# ---------------------------------------------------------------------------
# Helpers
# ---------------------------------------------------------------------------

def _full_spec(shape):
    rank = len(shape)
    return pl.BlockSpec(tuple(shape), lambda *_: (0,) * rank)


def _interp_matrix_1d(out_size, in_size):
    """PyTorch linear interpolation weights, align_corners=False (host numpy)."""
    scale = in_size / out_size
    dst = np.arange(out_size, dtype=np.float64)
    src = np.maximum(scale * (dst + 0.5) - 0.5, 0.0)
    i0 = np.clip(np.floor(src).astype(np.int64), 0, in_size - 1)
    i1 = np.minimum(i0 + 1, in_size - 1)
    w1 = src - i0
    w0 = 1.0 - w1
    m = np.zeros((out_size, in_size), dtype=np.float64)
    rows = np.arange(out_size)
    np.add.at(m, (rows, i0), w0)
    np.add.at(m, (rows, i1), w1)
    return m.astype(np.float32)


# ---------------------------------------------------------------------------
# Module
# ---------------------------------------------------------------------------

class SelfFeatureRegularizerPallas:
    def __init__(self, in_channels, spatial_size, temporal_size, hidden_size=32, seed=0):
        self.in_channels = list(in_channels)
        num_inputs = len(self.in_channels)
        assert num_inputs > 1
        self.num_inputs = num_inputs
        self.hidden_size = int(hidden_size)
        self.scale = self.hidden_size ** (-0.5)
        self.temporal_size = list(temporal_size)
        self.spatial_size = [tuple(ss) if isinstance(ss, (tuple, list)) else (ss, ss)
                             for ss in spatial_size]
        assert len(self.temporal_size) == num_inputs
        assert len(self.spatial_size) == num_inputs

        hd = self.hidden_size
        c_max = max(self.in_channels)
        self.c_max = c_max

        key = jax.random.PRNGKey(seed)
        w1_list, w2_list = [], []
        for c in self.in_channels:
            key, k1, k2 = jax.random.split(key, 3)
            w1 = jax.random.normal(k1, (c, hd), jnp.float32) * (2.0 / c) ** 0.5
            w1_list.append(jnp.pad(w1, ((0, c_max - c), (0, 0))))   # zero rows: no effect
            w2_list.append(jax.random.normal(k2, (hd, hd), jnp.float32)
                           * (2.0 / hd) ** 0.5)
        # Stacked parameter slabs: one VMEM operand each instead of 6 per input.
        self.w1_stack = jnp.stack(w1_list)                          # [I, Cmax, Hd]
        self.w2_stack = jnp.stack(w2_list)                          # [I, Hd, Hd]
        self.g1_stack = jnp.ones((num_inputs, 1, hd), jnp.float32)
        self.b1_stack = jnp.zeros((num_inputs, 1, hd), jnp.float32)
        self.g2_stack = jnp.ones((num_inputs, 1, hd), jnp.float32)
        self.b2_stack = jnp.zeros((num_inputs, 1, hd), jnp.float32)

        key, ks, kt = jax.random.split(key, 3)
        self.student_tokens = jax.random.normal(
            ks, (num_inputs - 1, hd), jnp.float32) * 0.02
        self.teacher_token = jax.random.normal(kt, (1, hd), jnp.float32) * 0.02
        # Parameter-only dot product hoisted to host constants.
        self.token_prod = tuple(
            float(v) for v in np.asarray(
                jax.device_get(jnp.sum(self.teacher_token * self.student_tokens,
                                       axis=-1))))

        # Separable trilinear interpolation operands (teacher grid -> student grids).
        t_in = self.temporal_size[-1]
        h_in, w_in = self.spatial_size[-1]
        self.t_in = t_in
        self.hw_in = h_in * w_in
        self.mt_np = []          # numpy [T_out, T_in] per student (compile-time)
        self.mhw_T = []          # jnp  [HW_in, HW_out] per student
        self.student_grids = []  # (T_out, H_out, W_out)
        for i in range(num_inputs - 1):
            t_o = self.temporal_size[i]
            h_o, w_o = self.spatial_size[i]
            self.mt_np.append(_interp_matrix_1d(t_o, t_in))
            mhw = np.kron(_interp_matrix_1d(h_o, h_in), _interp_matrix_1d(w_o, w_in))
            self.mhw_T.append(jnp.asarray(mhw.T))               # [HW_in, HW_out]
            self.student_grids.append((t_o, h_o, w_o))

    def forward(self, inputs):
        # Matches the PyTorch forward: drop the second-to-last input.
        inputs = list(inputs[:-2]) + [inputs[-1]]
        assert len(inputs) == self.num_inputs
        num_inputs = self.num_inputs

        # --- single streaming pass per input: global pool + channel mean ---
        pooled_list, cmean_list = [], []
        for x in inputs:
            n, c, t, h, w = x.shape
            p, cm = _fused_pool_and_channel_mean(x.reshape(n, c, t * h * w))
            pooled_list.append(p)
            cmean_list.append(cm)
        n = pooled_list[0].shape[0]

        # --- all key MLPs + attention in one launch ---
        pooled_stack = jnp.stack(
            [jnp.pad(p, ((0, 0), (0, self.c_max - p.shape[1]))) for p in pooled_list])
        k_num = num_inputs - 1
        attn_w = max(128, ((k_num + 127) // 128) * 128)        # lane-dense output slab
        kattn_args = (pooled_stack, self.w1_stack, self.g1_stack, self.b1_stack,
                      self.w2_stack, self.g2_stack, self.b2_stack)
        attn_padded = pl.pallas_call(
            functools.partial(_keys_attention_kernel, self.scale, num_inputs,
                              self.token_prod),
            grid=(1,),
            in_specs=[_full_spec(a.shape) for a in kattn_args],
            out_specs=_full_spec((n, attn_w)),
            out_shape=jax.ShapeDtypeStruct((n, attn_w), jnp.float32),
            compiler_params=pltpu.CompilerParams(
                dimension_semantics=("arbitrary",),
                vmem_limit_bytes=_VMEM_LIMIT_BYTES),
        )(*kattn_args)
        attention = attn_padded[:, :k_num]

        # --- student features: channel means already computed in the fused pass ---
        student_features = []
        for x, cm in zip(inputs[:-1], cmean_list[:-1]):
            _, _, t, h, w = x.shape
            student_features.append(cm.reshape(n, 1, t, h, w))

        # --- teacher features: separable trilinear upsample in one launch ---
        teacher_cm = cmean_list[-1].reshape(n, self.t_in, self.hw_in)
        out_shapes = tuple(jax.ShapeDtypeStruct((n, t_o, h_o * w_o), jnp.float32)
                           for (t_o, h_o, w_o) in self.student_grids)
        ups_args = (teacher_cm,) + tuple(self.mhw_T)
        ups = pl.pallas_call(
            functools.partial(_teacher_upsample_kernel, self.mt_np, self.t_in),
            grid=(1,),
            in_specs=[_full_spec(a.shape) for a in ups_args],
            out_specs=tuple(_full_spec(s.shape) for s in out_shapes),
            out_shape=out_shapes,
            compiler_params=pltpu.CompilerParams(
                dimension_semantics=("arbitrary",),
                vmem_limit_bytes=_VMEM_LIMIT_BYTES),
        )(*ups_args)
        teacher_features = [u.reshape(n, 1, t_o, h_o, w_o)
                            for u, (t_o, h_o, w_o) in zip(ups, self.student_grids)]

        return inputs, dict(attention=attention,
                            student_features=student_features,
                            teacher_features=teacher_features)


# ---------------------------------------------------------------------------
# Demo
# ---------------------------------------------------------------------------

if __name__ == "__main__":
    in_channels = [8, 16, 32]
    temporal_size = [2, 2, 1]
    spatial_size = [8, 4, 4]
    hidden_size = 32
    batch = 2

    model = SelfFeatureRegularizerPallas(in_channels, spatial_size, temporal_size,
                                         hidden_size=hidden_size, seed=0)

    key = jax.random.PRNGKey(0)
    k0, k1, kd, k2 = jax.random.split(key, 4)
    x0 = jax.random.normal(k0, (batch, 8, 2, 8, 8), jnp.float32)      # student 0
    x1 = jax.random.normal(k1, (batch, 16, 2, 4, 4), jnp.float32)     # student 1
    x_drop = jax.random.normal(kd, (batch, 6, 1, 3, 3), jnp.float32)  # dropped by forward
    x2 = jax.random.normal(k2, (batch, 32, 1, 4, 4), jnp.float32)     # teacher

    kept, extra = model.forward([x0, x1, x_drop, x2])
    jax.block_until_ready((kept, extra))
    print("KERNEL_OK")
</pallas_src>

<mosaic_0001>
module attributes {stable_mosaic.version = 11 : i64} {
  func.func @_pool_cmean_kernel(%arg0: i32, %arg1: memref<2x8x128xf32, #tpu.memory_space<vmem>>, %arg2: memref<2x8xf32, #tpu.memory_space<vmem>>, %arg3: memref<2x1x128xf32, #tpu.memory_space<vmem>>, %arg4: memref<2x8xf32, #tpu.memory_space<vmem>>) attributes {dimension_semantics = [#tpu.dimension_semantics<arbitrary>], iteration_bounds = array<i64: 1>, scalar_prefetch = 0 : i64, scratch_operands = 1 : i64, tpu.core_type = #tpu.core_type<tc>, window_params = [{transform_indices = @transform_0, window_bounds = array<i64: 2, 8, 128>}, {pipeline_mode = #tpu.pipeline_mode<synchronous>, transform_indices = @transform_1, window_bounds = array<i64: 2, 8>}, {transform_indices = @transform_2, window_bounds = array<i64: 2, 1, 128>}]} {
    %c0_i32 = arith.constant 0 : i32
    %0 = arith.cmpi eq, %arg0, %c0_i32 : i32
    %1 = arith.extui %0 : i1 to i32
    %c0_i32_0 = arith.constant 0 : i32
    %2 = arith.cmpi ne, %1, %c0_i32_0 : i32
    scf.if %2 {
      %cst_14 = arith.constant 0.000000e+00 : f32
      %16 = vector.broadcast %cst_14 : f32 to vector<2x8xf32>
      %c0_15 = arith.constant 0 : index
      %c0_16 = arith.constant 0 : index
      %17 = vector.load %arg4[%c0_15, %c0_16] : memref<2x8xf32, #tpu.memory_space<vmem>>, vector<2x8xf32>
      tpu.vector_store %arg4[%c0_15, %c0_16], %16 {strides = array<i32>} : memref<2x8xf32, #tpu.memory_space<vmem>>, vector<2x8xf32>,
    } else {
    }
    %c0 = arith.constant 0 : index
    %c0_1 = arith.constant 0 : index
    %c0_2 = arith.constant 0 : index
    %3 = vector.load %arg1[%c0, %c0_1, %c0_2] : memref<2x8x128xf32, #tpu.memory_space<vmem>>, vector<2x8x128xf32>
    %c0_3 = arith.constant 0 : index
    %c0_4 = arith.constant 0 : index
    %4 = vector.load %arg4[%c0_3, %c0_4] : memref<2x8xf32, #tpu.memory_space<vmem>>, vector<2x8xf32>
    %cst = arith.constant dense<0.000000e+00> : vector<2x8xf32>
    %5 = vector.multi_reduction <add>, %3, %cst [2] : vector<2x8x128xf32> to vector<2x8xf32>
    %6 = arith.addf %4, %5 : vector<2x8xf32>
    %c0_5 = arith.constant 0 : index
    %c0_6 = arith.constant 0 : index
    %7 = vector.load %arg4[%c0_5, %c0_6] : memref<2x8xf32, #tpu.memory_space<vmem>>, vector<2x8xf32>
    tpu.vector_store %arg4[%c0_5, %c0_6], %6 {strides = array<i32>} : memref<2x8xf32, #tpu.memory_space<vmem>>, vector<2x8xf32>,
    %cst_7 = arith.constant dense<0.000000e+00> : vector<2x128xf32>
    %8 = vector.multi_reduction <add>, %3, %cst_7 [1] : vector<2x8x128xf32> to vector<2x128xf32>
    %9 = vector.shape_cast %8 : vector<2x128xf32> to vector<2x1x128xf32>
    %cst_8 = arith.constant 8.000000e+00 : f32
    %10 = vector.broadcast %cst_8 : f32 to vector<2x1x128xf32>
    %11 = arith.divf %9, %10 : vector<2x1x128xf32>
    %c0_9 = arith.constant 0 : index
    %c0_10 = arith.constant 0 : index
    %c0_11 = arith.constant 0 : index
    %12 = vector.load %arg3[%c0_9, %c0_10, %c0_11] : memref<2x1x128xf32, #tpu.memory_space<vmem>>, vector<2x1x128xf32>
    tpu.vector_store %arg3[%c0_9, %c0_10, %c0_11], %11 {strides = array<i32>} : memref<2x1x128xf32, #tpu.memory_space<vmem>>, vector<2x1x128xf32>,
    %c0_i32_12 = arith.constant 0 : i32
    %13 = arith.cmpi eq, %arg0, %c0_i32_12 : i32
    %14 = arith.extui %13 : i1 to i32
    %c0_i32_13 = arith.constant 0 : i32
    %15 = arith.cmpi ne, %14, %c0_i32_13 : i32
    scf.if %15 {
      %c0_14 = arith.constant 0 : index
      %c0_15 = arith.constant 0 : index
      %16 = vector.load %arg4[%c0_14, %c0_15] : memref<2x8xf32, #tpu.memory_space<vmem>>, vector<2x8xf32>
      %cst_16 = arith.constant 7.812500e-03 : f32
      %17 = vector.broadcast %cst_16 : f32 to vector<2x8xf32>
      %18 = arith.mulf %16, %17 : vector<2x8xf32>
      %c0_17 = arith.constant 0 : index
      %c0_18 = arith.constant 0 : index
      %19 = vector.load %arg2[%c0_17, %c0_18] : memref<2x8xf32, #tpu.memory_space<vmem>>, vector<2x8xf32>
      tpu.vector_store %arg2[%c0_17, %c0_18], %18 {strides = array<i32>} : memref<2x8xf32, #tpu.memory_space<vmem>>, vector<2x8xf32>,
    } else {
    }
    return
  }
  func.func @transform_0(%arg0: i32) -> (i32, i32, i32) {
    %c0_i32 = arith.constant 0 : i32
    %c0_i32_0 = arith.constant 0 : i32
    %c0_i32_1 = arith.constant 0 : i32
    return %c0_i32, %c0_i32_0, %arg0 : i32, i32, i32
  }
  func.func @transform_1(%arg0: i32) -> (i32, i32) {
    %c0_i32 = arith.constant 0 : i32
    %c0_i32_0 = arith.constant 0 : i32
    %c0_i32_1 = arith.constant 0 : i32
    return %c0_i32, %c0_i32_0 : i32, i32
  }
  func.func @transform_2(%arg0: i32) -> (i32, i32, i32) {
    %c0_i32 = arith.constant 0 : i32
    %c0_i32_0 = arith.constant 0 : i32
    %c0_i32_1 = arith.constant 0 : i32
    return %c0_i32, %c0_i32_0, %arg0 : i32, i32, i32
  }
}

</mosaic_0001>

<bundles_post_ra>
// kernel: tpu_custom_call.1
= control target key start
LH: loop header
LB: loop body
LE: loop exit
PB: predicated region body
PF: predicated region fallthrough
CT: control target
= control target key end

     0   :  { %8 = vsyncpa [#allocation4], 0  ;;  %s253_s0 = inlined_call_operand.hbm [shape: f32[2,8,128], index: 0, kind: input, shape index: {}]   ;;  %s254_s1 = inlined_call_operand.hbm [shape: f32[2,8], index: 1, kind: output, shape index: {0}]   ;;  %s255_s2 = inlined_call_operand.hbm [shape: f32[2,1,128], index: 2, kind: output, shape index: {1}]  }
   0x1   :  { %9 = vsyncpa [#allocation5], 0 }
   0x2   :  { %10 = vsyncpa [#allocation8], 0  ;;  %s191_s9 = smov [#allocation3]   ;;  %s119_s13 = scalar_lea.hbm %s253_s0, 256 }
   0x3   :  { %s16_s10 = sshll.u32 %s191_s9, 4  ;;  %p120_p0 = scmp.ne.s32.totalorder %s253_s0, %s119_s13  ;;  %s17_s10 = int_to_ptr.vmem [resolvable:$true] %s16_s10 }
   0x4   :  { %p123_p1 = scmp.lt.u32.totalorder %s119_s13, %s253_s0 }
   0x6   :  { %p125_p2 = pnand %p123_p1, %p120_p0 }
   0x8   :  { %128 = shalt.err (!%p125_p2)
}
   0x9   :  { %s129_s18 = scalar_lea.vmem %s17_s10, 256  ;;  %p134_p4 = scmp.lt.s32.totalorder %s17_s10, %s17_s10 }
   0xa   :  { %p130_p3 = scmp.ne.s32.totalorder %s17_s10, %s129_s18  ;;  %p135_p5 = scmp.lt.s32.totalorder %s129_s18, %s129_s18 }
   0xc   :  { %p136_p6 = por %p135_p5, %p134_p4 }
   0xe   :  { %p137_p7 = pnand %p136_p6, %p130_p3 }
  0x10   :  { %140 = shalt.err (!%p137_p7)
}
  0x11   :  { %s192_s19 = smov 128   ;;  %s193_s20 = smov 8  }
  0x12   :  { %22 = dma.hbm_to_vmem [thread:$0]  %s253_s0, 256, %s17_s10, [#allocation4], %s192_s19, %s192_s19, %s193_s20  }
  0x13   :  { %185 = dma.done.wait [#allocation4], 256  }
  0x14   :  { %186 = vsyncadd [#allocation4], 4294967040  ;;  %v32_v0 = vld [vmem:[#allocation3] sm:$0xff]  ;;  %v33_v1 = vld [vmem:[#allocation3 + $0x8] sm:$0xff]  ;;  %vm30_vm0 = vcmask 58368   ;;  %v194_v16 = vmov 0.0  }
  0x15   :  { %35 = vadd.xlane.f32.xlu0 %v32_v0  ;;  %v57_v2 = vrot.slane %v32_v0, 4  ;;  %v63_v3 = vrot.slane %v33_v1, 4  ;;  %31 = vst.msk [vmem:[#allocation2] sm:$0x3] %vm30_vm0, %v194_v16  ;;  %s195_s0 = smov [#allocation7]  }
  0x16   :  { %s95_s23 = sshll.u32 %s195_s0, 4  ;;  %s96_s23 = int_to_ptr.vmem [resolvable:$true] %s95_s23 }
  0x17   :  { %v58_v4 = vadd.f32 %v57_v2, %v32_v0  ;;  %v64_v5 = vadd.f32 %v63_v3, %v33_v1  ;;  %s141_s24 = scalar_lea.vmem %s96_s23, 32  ;;  %p146_p9 = scmp.lt.s32.totalorder %s96_s23, %s96_s23 }
  0x18   :  { %p142_p8 = scmp.ne.s32.totalorder %s96_s23, %s141_s24  ;;  %p147_p10 = scmp.lt.s32.totalorder %s141_s24, %s141_s24 }
  0x19   :  { %v59_v6 = vrot.slane %v58_v4, 2  ;;  %v65_v7 = vrot.slane %v64_v5, 2  ;;  %37 = vadd.xlane.f32.xlu0 %v33_v1 }
  0x1a   :  { %p148_p11 = por %p147_p10, %p146_p9 }
  0x1b   :  { %v60_v8 = vadd.f32 %v59_v6, %v58_v4  ;;  %v66_v9 = vadd.f32 %v65_v7, %v64_v5 }
  0x1c   :  { %p149_p12 = pnand %p148_p11, %p142_p8 }
  0x1d   :  { %v61_v10 = vrot.slane %v60_v8, 1  ;;  %v67_v11 = vrot.slane %v66_v9, 1 }
  0x1f   :  { %v62_v12 = vadd.f32 %v61_v10, %v60_v8  ;;  %v68_v13 = vadd.f32 %v67_v11, %v66_v9 }
  0x21   :  { %v70_v14 = vmul.f32 0.125, %v62_v12  ;;  %v71_v15 = vmul.f32 0.125, %v68_v13 }
  0x23   :  { %72 = vst [vmem:[#allocation7] sm:$0x1] %v70_v14  ;;  %73 = vst [vmem:[#allocation7 + $0x1] sm:$0x1] %v71_v15 }
  0x24   :  { %152 = shalt.err (!%p149_p12)
}
  0x25   :  { %s153_s27 = scalar_lea.hbm %s255_s2, 32 }
  0x26   :  { %p154_p13 = scmp.ne.s32.totalorder %s255_s2, %s153_s27  ;;  %p157_p0 = scmp.lt.u32.totalorder %s153_s27, %s255_s2 }
  0x28   :  { %p159_p1 = pnand %p157_p0, %p154_p13 }
  0x2a   :  { %162 = shalt.err (!%p159_p1)
}
  0x2b   :  { %s196_s4 = smov 16   ;;  %s197_s5 = smov 1   ;;  %v41_v17 = vlaneseq  ;;  %vm51_vm1 = vcmask 1041409   ;;  %v34_v25 = vld [vmem:[#allocation2] sm:$0x3] }
  0x2c   :  { %101 = dma.vmem_to_hbm [thread:$0]  %s96_s23, 32, %s255_s2, [#allocation8], %s196_s4, %s196_s4, %s197_s5  }
  0x2d   :  { %v42_v18 = vand.u32 127, %v41_v17  ;;  %v44_v19 = vshrl.u32 %v41_v17, 7  ;;  %s198_s8 = smov [#allocation6]  }
  0x2e   :  { %s86_s9 = sshll.u32 %s198_s8, 4  ;;  %s87_s9 = int_to_ptr.vmem [resolvable:$true] %s86_s9 }
  0x2f   :  { %v45_v21 = vsub.s32 %v42_v18, %v44_v19  ;;  %s163_s2 = scalar_lea.vmem %s87_s9, 32  ;;  %p168_p3 = scmp.lt.s32.totalorder %s87_s9, %s87_s9 }
  0x30   :  { %p164_p2 = scmp.ne.s32.totalorder %s87_s9, %s163_s2  ;;  %p169_p4 = scmp.lt.s32.totalorder %s163_s2, %s163_s2 }
  0x32   :  { %p170_p5 = por %p169_p4, %p168_p3 }
  0x34   :  { %p171_p6 = pnand %p170_p5, %p164_p2 }
  0xa2   :  { %v36_v20 = vpop.xlane.xlu0 %35 }
  0xa3   :  { %v46_v23 = vrot.slane %v36_v20, %v45_v21 }
  0xa6   :  { %v38_v22 = vpop.xlane.xlu0 %37 }
  0xa7   :  { %v50_v24 = vrot.slane %v38_v22, %v45_v21 }
  0xa9   :  { %v52_v26 = vsel %vm51_vm1, %v50_v24, %v46_v23 }
  0xaa   :  { %v54_v27 = vadd.f32 %v52_v26, %v34_v25 }
  0xac   :  { %56 = vst.msk [vmem:[#allocation2] sm:$0x3] %vm30_vm0, %v54_v27 }
  0xb3   :  { %v77_v28 = vld [vmem:[#allocation2] sm:$0x3] }
  0xb4   :  { %v78_v29 = vmul.f32 0.0078125, %v77_v28 }
  0xb6   :  { %79 = vst.msk [vmem:[#allocation6] sm:$0x3] %vm30_vm0, %v78_v29 }
  0xb7   :  { %174 = shalt.err (!%p171_p6)
}
  0xb8   :  { %s175_s12 = scalar_lea.hbm %s254_s1, 32 }
  0xb9   :  { %p176_p7 = scmp.ne.s32.totalorder %s254_s1, %s175_s12  ;;  %p179_p8 = scmp.lt.u32.totalorder %s175_s12, %s254_s1 }
  0xbb   :  { %p181_p9 = pnand %p179_p8, %p176_p7 }
  0xbd   :  { %184 = shalt.err (!%p181_p9)
}
  0xbe   :  { %89 = dma.vmem_to_hbm [thread:$0]  %s87_s9, 32, %s254_s1, [#allocation5]  }
  0xbf   :  { %187 = dma.done.wait [#allocation5], 32  }
  0xc0   :  { %188 = vsyncadd [#allocation5], 4294967264 }
  0xc1   :  { %189 = dma.done.wait [#allocation8], 32  }
  0xc2   :  { %190 = vsyncadd [#allocation8], 4294967264 }
  0xc3   :  { %108 = vsyncpa [#allocation4], 1 }
  0xc4   :  { %109 = vsyncpa [#allocation5], 1 }
  0xc5   :  { %110 = vsyncpa [#allocation8], 1 }

</bundles_post_ra>
